<compile_context>
chip_gen: v5e
topology: v5e:2x2
jax: 0.10.0
libtpu: 0.0.40
codegen_flags: <defaults>
</compile_context>

<pallas_src>
import math

import jax
import jax.numpy as jnp
from jax.experimental import pallas as pl
from jax.experimental.pallas import tpu as pltpu


# ---------------------------------------------------------------------------
# tile pickers (respect the (8, 128) BlockSpec constraint)
# ---------------------------------------------------------------------------
def _pick_row_tile(dim, max_tile):
    """Second-to-last-dim tile: multiple of 8, a divisor of dim, or the full dim."""
    if dim <= max_tile:
        return dim
    start = max_tile - (max_tile % 8)
    for t in range(start, 7, -8):
        if dim % t == 0:
            return t
    return dim  # no nice divisor -> fall back to the full dim


def _pick_lane_tile(dim, max_tile):
    """Last-dim tile: multiple of 128, a divisor of dim, or the full dim."""
    if dim <= max_tile:
        return dim
    start = max_tile - (max_tile % 128)
    for t in range(start, 127, -128):
        if dim % t == 0:
            return t
    return dim


# ---------------------------------------------------------------------------
# Kernel 1: support = X @ W   (hoisted out of the batch loop; one big matmul)
# ---------------------------------------------------------------------------
def _support_kernel(x_ref, w_ref, s_ref):
    # x_ref: (TMS, Fin), w_ref: (Fin, Fp), s_ref: (TMS, Fp) bf16
    x = x_ref[...].astype(jnp.bfloat16)        # in-kernel cast (no wrapper pass)
    w = w_ref[...].astype(jnp.bfloat16)
    s = jnp.dot(x, w, preferred_element_type=jnp.float32)
    s_ref[...] = s.astype(s_ref.dtype)


# ---------------------------------------------------------------------------
# Kernel 2: out = adj @ support (+ bias), row/K tiled with f32 accumulator
# ---------------------------------------------------------------------------
def _aggregate_kernel(adj_ref, s_ref, b_ref, o_ref, acc_ref):
    # adj_ref: (1, TM, TK), s_ref: (1, TK, Fp) bf16, b_ref: (1, Fp),
    # o_ref: (1, TM, Fp), acc_ref: (TM, Fp) f32 scratch
    k = pl.program_id(2)

    @pl.when(k == 0)
    def _():
        acc_ref[...] = jnp.zeros_like(acc_ref)

    a = adj_ref[0].astype(jnp.bfloat16)        # mirrors adj.float(); bf16 MXU operand
    s = s_ref[0]                               # already bf16
    acc_ref[...] += jnp.dot(a, s, preferred_element_type=jnp.float32)

    @pl.when(k == pl.num_programs(2) - 1)
    def _():
        o_ref[0] = (acc_ref[...] + b_ref[...].astype(jnp.float32)).astype(o_ref.dtype)


# ---------------------------------------------------------------------------
# wrapper
# ---------------------------------------------------------------------------
def graph_convolution(x, adj, weight, bias=None, *, out_dtype=jnp.float32):
    """Pallas GCN forward.

    x:      (B, N, Fin)  float (any float dtype; cast to bf16 in-kernel)
    adj:    (B, N, N)    float/int (cast in-kernel, mirroring adj.float())
    weight: (Fin, Fout)  float
    bias:   optional (Fout,) / (1, 1, Fout)
    returns (B, N, Fout) out_dtype (default f32, matching the PyTorch module;
            pass out_dtype=jnp.bfloat16 to halve the output writeback)
    """
    B, N, Fin = x.shape
    Fin_w, Fout = weight.shape
    assert Fin_w == Fin, (Fin_w, Fin)
    assert adj.shape == (B, N, N), adj.shape

    # Lane-dense stores: pad Fout up to a multiple of 128, slice off at the end.
    Fp = ((Fout + 127) // 128) * 128
    w_p = weight if Fp == Fout else jnp.pad(weight, ((0, 0), (0, Fp - Fout)))
    if bias is None:
        b_p = jnp.zeros((1, Fp), dtype=jnp.float32)
    else:
        b2 = jnp.reshape(bias, (1, Fout)).astype(jnp.float32)
        b_p = b2 if Fp == Fout else jnp.pad(b2, ((0, 0), (0, Fp - Fout)))

    # ---- kernel 1: support = X @ W over the fused M = B*N dimension ---------
    M = B * N
    x2 = jnp.reshape(x, (M, Fin))              # leading-dim reshape: no data movement
    tms = _pick_row_tile(M, 512)
    # TODO(synk): for very large Fin, also K-tile this matmul; GCN feature dims
    # are normally small enough that the full contraction fits a single block.
    support = pl.pallas_call(
        _support_kernel,
        out_shape=jax.ShapeDtypeStruct((M, Fp), jnp.bfloat16),
        grid_spec=pltpu.PrefetchScalarGridSpec(
            num_scalar_prefetch=0,
            grid=(M // tms,),
            in_specs=[
                pl.BlockSpec((tms, Fin), lambda i: (i, 0)),
                pl.BlockSpec((Fin, Fp), lambda i: (0, 0)),
            ],
            out_specs=pl.BlockSpec((tms, Fp), lambda i: (i, 0)),
        ),
        compiler_params=pltpu.CompilerParams(dimension_semantics=("parallel",)),
    )(x2, w_p)
    support = jnp.reshape(support, (B, N, Fp))

    # ---- kernel 2: out = adj @ support (+ bias), row/K tiled ----------------
    tm = _pick_row_tile(N, 256)                # output-row tile
    tk = _pick_lane_tile(N, 512)               # contraction tile
    out_p = pl.pallas_call(
        _aggregate_kernel,
        out_shape=jax.ShapeDtypeStruct((B, N, Fp), out_dtype),
        grid_spec=pltpu.PrefetchScalarGridSpec(
            num_scalar_prefetch=0,
            grid=(B, N // tm, N // tk),
            in_specs=[
                pl.BlockSpec((1, tm, tk), lambda b, i, k: (b, i, k)),   # adj tile
                pl.BlockSpec((1, tk, Fp), lambda b, i, k: (b, k, 0)),   # support tile
                pl.BlockSpec((1, Fp), lambda b, i, k: (0, 0)),          # bias
            ],
            out_specs=pl.BlockSpec((1, tm, Fp), lambda b, i, k: (b, i, 0)),
            scratch_shapes=[pltpu.VMEM((tm, Fp), jnp.float32)],
        ),
        compiler_params=pltpu.CompilerParams(
            dimension_semantics=("parallel", "parallel", "arbitrary")
        ),
    )(adj, support, b_p)

    if Fp != Fout:
        out_p = out_p[..., :Fout]
    return out_p


def xavier_normal(key, fan_in, fan_out, gain=1.0):
    # Matches torch.nn.init.xavier_normal_: std = gain * sqrt(2 / (fan_in + fan_out))
    std = gain * math.sqrt(2.0 / float(fan_in + fan_out))
    return std * jax.random.normal(key, (fan_in, fan_out), dtype=jnp.float32)


if __name__ == "__main__":
    key = jax.random.PRNGKey(0)
    k_x, k_adj, k_w = jax.random.split(key, 3)

    B, N, Fin, Fout = 2, 16, 32, 32

    x = jax.random.normal(k_x, (B, N, Fin), dtype=jnp.float32)
    adj_raw = jax.random.uniform(k_adj, (B, N, N), dtype=jnp.float32)
    adj = (adj_raw + jnp.swapaxes(adj_raw, -1, -2)) * 0.5

    weight = xavier_normal(k_w, Fin, Fout)
    bias = jnp.full((1, 1, Fout), 0.1, dtype=jnp.float32)   # module inits bias to 0.1

    out_nobias = graph_convolution(x, adj, weight, bias=None)   # bias=False (default)
    out_bias = graph_convolution(x, adj, weight, bias=bias)     # bias=True
    jax.block_until_ready(out_nobias)
    jax.block_until_ready(out_bias)

    # Reference with matched numerics (bf16 operands, f32 accumulation) -> tight check.
    sup_ref = jnp.matmul(
        x.astype(jnp.bfloat16), weight.astype(jnp.bfloat16),
        preferred_element_type=jnp.float32,
    ).astype(jnp.bfloat16)
    ref_bf16 = jnp.matmul(
        adj.astype(jnp.bfloat16), sup_ref, preferred_element_type=jnp.float32
    )
    # Full-f32 reference (exact PyTorch semantics) -> loose check (bf16 MXU trade-off).
    ref_f32 = jnp.matmul(adj, jnp.matmul(x, weight))

    assert jnp.allclose(out_nobias, ref_bf16, atol=2e-2, rtol=2e-2)
    assert jnp.allclose(out_bias, ref_bf16 + 0.1, atol=2e-2, rtol=2e-2)
    assert jnp.allclose(out_nobias, ref_f32, atol=2e-1, rtol=1e-1)

    print("KERNEL_OK")
</pallas_src>

<mosaic_0001>
module attributes {stable_mosaic.version = 11 : i64} {
  func.func @_support_kernel(%arg0: i32, %arg1: memref<32x32xf32, #tpu.memory_space<vmem>>, %arg2: memref<32x128xf32, #tpu.memory_space<vmem>>, %arg3: memref<32x128xbf16, #tpu.memory_space<vmem>>) attributes {dimension_semantics = [#tpu.dimension_semantics<parallel>], iteration_bounds = array<i64: 1>, scalar_prefetch = 0 : i64, scratch_operands = 0 : i64, tpu.core_type = #tpu.core_type<tc>, window_params = [{transform_indices = @transform_0, window_bounds = array<i64: 32, 32>}, {pipeline_mode = #tpu.pipeline_mode<synchronous>, transform_indices = @transform_1, window_bounds = array<i64: 32, 128>}, {transform_indices = @transform_2, window_bounds = array<i64: 32, 128>}]} {
    %c0 = arith.constant 0 : index
    %c0_0 = arith.constant 0 : index
    %0 = vector.load %arg1[%c0, %c0_0] : memref<32x32xf32, #tpu.memory_space<vmem>>, vector<32x32xf32>
    %1 = arith.truncf %0 : vector<32x32xf32> to vector<32x32xbf16>
    %c0_1 = arith.constant 0 : index
    %c0_2 = arith.constant 0 : index
    %2 = vector.load %arg2[%c0_1, %c0_2] : memref<32x128xf32, #tpu.memory_space<vmem>>, vector<32x128xf32>
    %3 = arith.truncf %2 : vector<32x128xf32> to vector<32x128xbf16>
    %cst = arith.constant dense<0.000000e+00> : vector<32x128xf32>
    %4 = tpu.matmul %1, %3, %cst {dimension_numbers = #tpu.dot_dimension_numbers<[1], [0], [0], [1], [0, 0, 1, 1], [], []>} : vector<32x32xbf16>, vector<32x128xbf16>, vector<32x128xf32> -> vector<32x128xf32>
    %5 = arith.truncf %4 : vector<32x128xf32> to vector<32x128xbf16>
    %c0_3 = arith.constant 0 : index
    %c0_4 = arith.constant 0 : index
    %6 = vector.load %arg3[%c0_3, %c0_4] : memref<32x128xbf16, #tpu.memory_space<vmem>>, vector<32x128xbf16>
    tpu.vector_store %arg3[%c0_3, %c0_4], %5 {strides = array<i32>} : memref<32x128xbf16, #tpu.memory_space<vmem>>, vector<32x128xbf16>,
    return
  }
  func.func @transform_0(%arg0: i32) -> (i32, i32) {
    %c0_i32 = arith.constant 0 : i32
    %c0_i32_0 = arith.constant 0 : i32
    return %arg0, %c0_i32 : i32, i32
  }
  func.func @transform_1(%arg0: i32) -> (i32, i32) {
    %c0_i32 = arith.constant 0 : i32
    %c0_i32_0 = arith.constant 0 : i32
    %c0_i32_1 = arith.constant 0 : i32
    return %c0_i32, %c0_i32_0 : i32, i32
  }
  func.func @transform_2(%arg0: i32) -> (i32, i32) {
    %c0_i32 = arith.constant 0 : i32
    %c0_i32_0 = arith.constant 0 : i32
    return %arg0, %c0_i32 : i32, i32
  }
}

</mosaic_0001>

<bundles_post_ra>
// kernel: tpu_custom_call.1
= control target key start
LH: loop header
LB: loop body
LE: loop exit
PB: predicated region body
PF: predicated region fallthrough
CT: control target
= control target key end

     0   :  { %7 = vsyncpa [#allocation3], 0  ;;  %s242_s0 = inlined_call_operand.hbm [shape: f32[32,32], index: 0, kind: input, shape index: {}]   ;;  %s243_s1 = inlined_call_operand.hbm [shape: f32[32,128], index: 1, kind: input, shape index: {}]   ;;  %s244_s2 = inlined_call_operand.hbm [shape: bf16[32,128], index: 2, kind: output, shape index: {}]  }
   0x1   :  { %8 = vsyncpa [#allocation6], 0 }
   0x2   :  { %9 = vsyncpa [#allocation4], 0  ;;  %s14_s11 = sshll.u32 %s242_s0, 4  ;;  %s211_s12 = smov [#allocation2]   ;;  %s15_s11 = int_to_ptr.hbm [resolvable:$true] %s14_s11 }
   0x3   :  { %s16_s13 = sshll.u32 %s211_s12, 4  ;;  %s27_s16 = sshll.u32 %s243_s1, 4  ;;  %s17_s13 = int_to_ptr.vmem [resolvable:$true] %s16_s13  ;;  %s28_s16 = int_to_ptr.hbm [resolvable:$true] %s27_s16 }
   0x4   :  { %s212_s17 = smov 128   ;;  %s213_s18 = smov 8  }
   0x5   :  { %22 = dma.hbm_to_vmem [thread:$0]  %s15_s11, 512, %s17_s13, [#allocation3], %s212_s17, %s212_s17, %s213_s18  }
   0x6   :  { %s214_s19 = smov [#allocation5]  }
   0x7   :  { %s29_s20 = sshll.u32 %s214_s19, 4  ;;  %s30_s20 = int_to_ptr.vmem [resolvable:$true] %s29_s20 }
   0x8   :  { %35 = dma.hbm_to_vmem [thread:$0]  %s28_s16, 512, %s30_s20, [#allocation6], %s212_s17, %s212_s17, %s213_s18  }
   0x9   :  { %205 = dma.done.wait [#allocation3], 512  }
   0xa   :  { %206 = vsyncadd [#allocation3], 4294966784 }
   0xb   :  { %207 = dma.done.wait [#allocation6], 512  }
   0xc   :  { %208 = vsyncadd [#allocation6], 4294966784  ;;  %v53_v0 = vld [vmem:[#allocation5 + $0x10] sm:$0xff]  ;;  %v54_v1 = vld [vmem:[#allocation5 + $0x18] sm:$0xff]  ;;  %vm57_vm0 = vcmask 261120   ;;  %s215_s0 = smov [#allocation7]  }
   0xd   :  { %v51_v2 = vld [vmem:[#allocation5] sm:$0xff]  ;;  %v56_v3 = vpack.c.bf16 %v54_v1, %v53_v0  ;;  %v52_v4 = vld [vmem:[#allocation5 + $0x8] sm:$0xff]  ;;  %v47_v8 = vld [vmem:[#allocation2 + $0x10] sm:$0xff]  ;;  %s95_s1 = sshll.u32 %s215_s0, 4  ;;  %s97_s23 = sshll.u32 %s244_s2, 4  ;;  %s96_s1 = int_to_ptr.vmem [resolvable:$true] %s95_s1  ;;  %s98_s23 = int_to_ptr.hbm [resolvable:$true] %s97_s23 }
   0xe   :  { %v45_v5 = vld [vmem:[#allocation2] sm:$0xff]  ;;  %v55_v6 = vpack.c.bf16 %v52_v4, %v51_v2  ;;  %v46_v7 = vld [vmem:[#allocation2 + $0x8] sm:$0xff]  ;;  %v48_v9 = vld [vmem:[#allocation2 + $0x18] sm:$0xff]  ;;  %s216_s24 = smov 64   ;;  %s217_s25 = smov 4  }
   0xf   :  { %70 = vmatpush.bf16.msra.mxu0 %v56_v3  ;;  %124 = vmatpush.bf16.msra.mxu1 %v56_v3  ;;  %v49_v10 = vpack.c.bf16 %v46_v7, %v45_v5  ;;  %v50_v11 = vpack.c.bf16 %v48_v9, %v47_v8 }
  0x13   :  { %71 = vmatpush.bf16.msra.mxu0 %v55_v6  ;;  %125 = vmatpush.bf16.msra.mxu1 %v55_v6 }
  0x16   :  { %111 = vmatmul.msk.bf16.vlgmr.msra.gmra.mxu0 %vm57_vm0, %v49_v10  ;;  %112 = vmatmul.msk.bf16.vlgmr.msra.gmra.mxu1 %vm57_vm0, %v50_v11 }
  0x93   :  { %v73_v12 = vpop.f32.mrf.mxu0  ;;  %v78_v13 = vpop.f32.mrf.mxu1 }
  0x9b   :  { %v75_v14 = vpop.f32.mrf.mxu0  ;;  %v80_v15 = vpop.f32.mrf.mxu1 }
  0x9c   :  { %v116_v16 = vpack.c.bf16 %v75_v14, %v73_v12  ;;  %v121_v17 = vpack.c.bf16 %v80_v15, %v78_v13 }
  0x9e   :  { %117 = vst [vmem:[#allocation7] sm:$0xff] %v116_v16  }
  0x9f   :  { %123 = vst [vmem:[#allocation7 + $0x8] sm:$0xff] %v121_v17  }
  0xa0   :  { %103 = dma.vmem_to_hbm [thread:$0]  %s96_s1, 256, %s98_s23, [#allocation4], %s216_s24, %s216_s24, %s217_s25  }
  0xa1   :  { %209 = dma.done.wait [#allocation4], 256  }
  0xa2   :  { %210 = vsyncadd [#allocation4], 4294967040 }
  0xa3   :  { %108 = vsyncpa [#allocation3], 1 }
  0xa4   :  { %109 = vsyncpa [#allocation6], 1 }
  0xa5   :  { %110 = vsyncpa [#allocation4], 1 }

</bundles_post_ra>
